<compile_context>
chip_gen: v6e
topology: v6e:2x2x1
jax: 0.10.0
libtpu: 0.0.40
codegen_flags: <defaults>
</compile_context>

<pallas_src>
import jax
import jax.numpy as jnp
from jax.experimental import pallas as pl
from jax.experimental.pallas import tpu as pltpu

EPS = 1e-10
JITTER = 1e-06


def _round_up(v, m):
    return ((v + m - 1) // m) * m


# ----------------------------------------------------------------------------
# Pallas kernel: one (tm, tn) tile of K = matern3 + matern5 + linear.
#
#   a3/a5  : (tm, D+2) = [-2*x1*w, ||x1||_w^2, 1]      with w = 1/len^2
#   b3t/b5t: (D+2, tn) = [x2, 1, ||x2||_w^2]^T
#   al     : (tm, D)   = coe_lin * x1
#   blt    : (D, tn)   = x2^T
#   coef   : (1, 2) SMEM = [coe_matern3, coe_matern5]
#
# a @ bt yields the length-scale-weighted squared distance directly (the
# row/col norms ride inside the MXU contraction), so no transpose or
# broadcast-add is needed in-kernel.
# ----------------------------------------------------------------------------
def _composite_kernel_tile(a3_ref, b3t_ref, a5_ref, b5t_ref, al_ref, blt_ref,
                           coef_ref, out_ref):
    coe3 = coef_ref[0, 0]
    coe5 = coef_ref[0, 1]

    # linear term (coe_lin already folded into al)
    k = jnp.dot(al_ref[...], blt_ref[...], preferred_element_type=jnp.float32)

    # matern 3/2
    sq3 = jnp.dot(a3_ref[...], b3t_ref[...], preferred_element_type=jnp.float32)
    d3 = jnp.sqrt(3.0 * jnp.maximum(sq3, 0.0))
    k = k + coe3 * ((1.0 + d3) * jnp.exp(-d3))

    # matern 5/2
    sq5 = jnp.dot(a5_ref[...], b5t_ref[...], preferred_element_type=jnp.float32)
    d5 = jnp.sqrt(5.0 * jnp.maximum(sq5, 0.0))
    k = k + coe5 * ((1.0 + d5 + d5 * d5 * (1.0 / 3.0)) * jnp.exp(-d5))

    out_ref[...] = k


def kernel_customized(x1, x2, params, *, tm_max=256, tn_max=512):
    """Composite kernel K(x1, x2) = matern3 + matern5 + linear via one pallas_call."""
    x1 = x1.astype(jnp.float32)
    x2 = x2.astype(jnp.float32)
    n1, d = x1.shape
    n2 = x2.shape[0]
    da = d + 2

    # One-sided weights (1/len^2) and coefficients, computed once in the wrapper.
    w3 = jnp.exp(-2.0 * params["log_length_matern3"]).astype(jnp.float32)
    w5 = jnp.exp(-2.0 * params["log_length_matern5"]).astype(jnp.float32)
    coe_lin = jnp.exp(params["log_coe_linear"]).astype(jnp.float32)          # (1,)
    coefs = jnp.concatenate([jnp.exp(params["log_coe_matern3"]),
                             jnp.exp(params["log_coe_matern5"])]
                            ).astype(jnp.float32).reshape(1, 2)

    # Augmented operands: (A @ B^T)[i, j] == sum_d w_d * (x1_id - x2_jd)^2
    def aug_lhs(a, w):
        an = jnp.sum(a * a * w, axis=1, keepdims=True)
        return jnp.concatenate([-2.0 * (a * w), an, jnp.ones_like(an)], axis=1)

    def aug_rhs(b, w):
        bn = jnp.sum(b * b * w, axis=1, keepdims=True)
        return jnp.concatenate([b, jnp.ones_like(bn), bn], axis=1)

    a3 = aug_lhs(x1, w3)
    a5 = aug_lhs(x1, w5)
    al = coe_lin * x1
    b3 = aug_rhs(x2, w3)
    b5 = aug_rhs(x2, w5)
    bl = x2

    # Tile sizes: (8,128)-aligned, small enough to stay comfortably inside the
    # scoped VMEM limit on every generation (incl. v7x's 64 MiB physical VMEM):
    # a 256x512 f32 output block is 0.5 MiB; all live temps stay in the low MiB.
    tm = min(tm_max, _round_up(n1, 8))
    tn = min(tn_max, _round_up(n2, 128))
    n1p = _round_up(n1, tm)
    n2p = _round_up(n2, tn)

    def pad_rows(m, rows):
        return jnp.pad(m, ((0, rows - m.shape[0]), (0, 0)))

    a3 = pad_rows(a3, n1p)
    a5 = pad_rows(a5, n1p)
    al = pad_rows(al, n1p)
    # RHS operands pre-transposed -> plain "nn" matmuls in-kernel and lane-dense blocks.
    b3t = pad_rows(b3, n2p).T
    b5t = pad_rows(b5, n2p).T
    blt = pad_rows(bl, n2p).T

    grid = (n1p // tm, n2p // tn)
    lhs_aug_spec = pl.BlockSpec((tm, da), lambda i, j: (i, 0))
    lhs_lin_spec = pl.BlockSpec((tm, d), lambda i, j: (i, 0))
    rhs_aug_spec = pl.BlockSpec((da, tn), lambda i, j: (0, j))
    rhs_lin_spec = pl.BlockSpec((d, tn), lambda i, j: (0, j))
    coef_spec = pl.BlockSpec((1, 2), lambda i, j: (0, 0),
                             memory_space=pltpu.MemorySpace.SMEM)

    out = pl.pallas_call(
        _composite_kernel_tile,
        out_shape=jax.ShapeDtypeStruct((n1p, n2p), jnp.float32),
        grid=grid,
        in_specs=[lhs_aug_spec, rhs_aug_spec,
                  lhs_aug_spec, rhs_aug_spec,
                  lhs_lin_spec, rhs_lin_spec,
                  coef_spec],
        out_specs=pl.BlockSpec((tm, tn), lambda i, j: (i, j)),
        compiler_params=pltpu.CompilerParams(
            dimension_semantics=("parallel", "parallel")),
    )(a3, b3t, a5, b5t, al, blt, coefs)

    return out[:n1, :n2]


# ----------------------------------------------------------------------------
# Pure-JAX reference of the composite kernel (for the correctness check only).
# ----------------------------------------------------------------------------
def _kernel_customized_ref(x1, x2, params):
    def sqdist(a, b, log_len):
        a = a / jnp.exp(log_len)
        b = b / jnp.exp(log_len)
        return (jnp.sum(a * a, 1)[:, None] - 2.0 * a @ b.T + jnp.sum(b * b, 1)[None, :])

    d3 = jnp.sqrt(3.0 * jnp.maximum(sqdist(x1, x2, params["log_length_matern3"]), 0.0))
    d5 = jnp.sqrt(5.0 * jnp.maximum(sqdist(x1, x2, params["log_length_matern5"]), 0.0))
    k3 = jnp.exp(params["log_coe_matern3"][0]) * (1.0 + d3) * jnp.exp(-d3)
    k5 = jnp.exp(params["log_coe_matern5"][0]) * (1.0 + d5 + d5 * d5 / 3.0) * jnp.exp(-d5)
    kl = jnp.exp(params["log_coe_linear"][0]) * (x1 @ x2.T)
    return k3 + k5 + kl


# ----------------------------------------------------------------------------
# CIGP "module": deterministic parameter init + forward pass
# ----------------------------------------------------------------------------
def cigp_init(x, y, normal_y_mode=0):
    x = x.astype(jnp.float32)
    y = y.astype(jnp.float32)
    x_mean = x.mean(axis=0)
    x_std = jnp.std(x, axis=0, ddof=1)            # torch.std -> unbiased
    xn = (x - x_mean) / (x_std + EPS)

    if normal_y_mode == 0:
        y_mean = y.mean()
        y_std = jnp.std(y, ddof=1)
    elif normal_y_mode == 1:
        y_mean = y.mean(axis=0)
        y_std = jnp.std(y, axis=0, ddof=1)
    else:
        y_mean = jnp.zeros((1,), jnp.float32)
        y_std = jnp.ones((1,), jnp.float32)
    yn = (y - y_mean) / (y_std + EPS)

    d = x.shape[1]
    params = dict(
        log_beta=jnp.ones((1,), jnp.float32) * -8.0,
        log_length_rbf=jnp.zeros((d,), jnp.float32),
        log_coe_rbf=jnp.zeros((1,), jnp.float32),
        log_coe_linear=jnp.zeros((1,), jnp.float32),
        log_length_matern3=jnp.zeros((d,), jnp.float32),
        log_coe_matern3=jnp.zeros((1,), jnp.float32),
        log_length_matern5=jnp.zeros((d,), jnp.float32),
        log_coe_matern5=jnp.zeros((1,), jnp.float32),
    )
    return dict(
        x=xn, y=yn,
        x_mean=x_mean, x_std=x_std,
        y_mean=y_mean, y_std=y_std,
        params=params,
    )


def cigp_forward(state, x_te):
    x = state["x"]
    y = state["y"]
    params = state["params"]

    # normalize test inputs (matches torch forward: no EPS here)
    x_te_n = (x_te.astype(jnp.float32) - state["x_mean"]) / state["x_std"]

    n = x.shape[0]
    beta_inv = jnp.exp(-params["log_beta"][0])

    # ONE fused Pallas launch: K(x, [x ; x_te]) -> slice k_xx and kx.
    z_all = jnp.concatenate([x, x_te_n], axis=0)
    k_all = kernel_customized(x, z_all, params)
    k_xx = k_all[:, :n]
    kx = k_all[:, n:]

    sigma = k_xx + (beta_inv + JITTER) * jnp.eye(n, dtype=jnp.float32)

    # TODO(synk): Cholesky / triangular solves have no clean Pallas TPU
    # equivalent; done with jax.numpy / jax.scipy on these small matrices.
    L = jnp.linalg.cholesky(sigma)
    l_inv_kx = jax.scipy.linalg.solve_triangular(L, kx, lower=True)
    alpha = jax.scipy.linalg.cho_solve((L, True), y)

    mean = kx.T @ alpha

    # Closed-form diag(K(x_te, x_te)): Matern kernels equal their coefficient at
    # zero distance; the linear kernel contributes coe_lin * ||x_te||^2.
    coe3 = jnp.exp(params["log_coe_matern3"][0])
    coe5 = jnp.exp(params["log_coe_matern5"][0])
    coe_lin = jnp.exp(params["log_coe_linear"][0])
    diag_tt = coe3 + coe5 + coe_lin * jnp.sum(x_te_n * x_te_n, axis=1)

    var_diag = diag_tt.reshape(-1, 1) - jnp.sum(l_inv_kx ** 2, axis=0).reshape(-1, 1)
    var_diag = var_diag + beta_inv

    mean = mean * state["y_std"] + state["y_mean"]
    var_diag = jnp.broadcast_to(var_diag, mean.shape) * state["y_std"] ** 2
    return mean, var_diag


# ----------------------------------------------------------------------------
if __name__ == "__main__":
    key = jax.random.PRNGKey(0)
    k1, k2, k3 = jax.random.split(key, 3)

    n_train, n_test, d_in, d_out = 16, 8, 4, 2
    x_train = jax.random.normal(k1, (n_train, d_in), dtype=jnp.float32)
    y_train = jnp.concatenate(
        [jnp.sin(x_train.sum(axis=1, keepdims=True)),
         jnp.cos(x_train.sum(axis=1, keepdims=True))], axis=1
    ) + 0.01 * jax.random.normal(k2, (n_train, d_out), dtype=jnp.float32)
    x_test = jax.random.normal(k3, (n_test, d_in), dtype=jnp.float32)

    state = cigp_init(x_train, y_train, normal_y_mode=0)

    # Pallas kernel vs. pure-JAX reference on the fused kernel matrix.
    x_te_n = (x_test - state["x_mean"]) / state["x_std"]
    z_all = jnp.concatenate([state["x"], x_te_n], axis=0)
    k_pallas = kernel_customized(state["x"], z_all, state["params"])
    k_ref = _kernel_customized_ref(state["x"], z_all, state["params"])
    jax.block_until_ready((k_pallas, k_ref))
    assert bool(jnp.allclose(k_pallas, k_ref, rtol=1e-4, atol=1e-3))

    mean, var_diag = cigp_forward(state, x_test)
    jax.block_until_ready((mean, var_diag))

    assert mean.shape == (n_test, d_out)
    assert var_diag.shape == (n_test, d_out)
    assert bool(jnp.all(jnp.isfinite(mean))) and bool(jnp.all(jnp.isfinite(var_diag)))
    print("KERNEL_OK")
</pallas_src>

<mosaic_0001>
module attributes {stable_mosaic.version = 11 : i64} {
  func.func @_composite_kernel_tile(%arg0: i32, %arg1: i32, %arg2: memref<16x6xf32, #tpu.memory_space<vmem>>, %arg3: memref<6x128xf32, #tpu.memory_space<vmem>>, %arg4: memref<16x6xf32, #tpu.memory_space<vmem>>, %arg5: memref<6x128xf32, #tpu.memory_space<vmem>>, %arg6: memref<16x4xf32, #tpu.memory_space<vmem>>, %arg7: memref<4x128xf32, #tpu.memory_space<vmem>>, %arg8: memref<1x2xf32, #tpu.memory_space<smem>>, %arg9: memref<16x128xf32, #tpu.memory_space<vmem>>) attributes {dimension_semantics = [#tpu.dimension_semantics<parallel>, #tpu.dimension_semantics<parallel>], iteration_bounds = array<i64: 1, 1>, scalar_prefetch = 0 : i64, scratch_operands = 0 : i64, tpu.core_type = #tpu.core_type<tc>, window_params = [{transform_indices = @transform_0, window_bounds = array<i64: 16, 6>}, {transform_indices = @transform_1, window_bounds = array<i64: 6, 128>}, {transform_indices = @transform_2, window_bounds = array<i64: 16, 6>}, {transform_indices = @transform_3, window_bounds = array<i64: 6, 128>}, {transform_indices = @transform_4, window_bounds = array<i64: 16, 4>}, {transform_indices = @transform_5, window_bounds = array<i64: 4, 128>}, {transform_indices = @transform_6, window_bounds = array<i64: 1, 2>}, {transform_indices = @transform_7, window_bounds = array<i64: 16, 128>}]} {
    %c0 = arith.constant 0 : index
    %c0_0 = arith.constant 0 : index
    %0 = memref.load %arg8[%c0, %c0_0] : memref<1x2xf32, #tpu.memory_space<smem>>
    %c0_1 = arith.constant 0 : index
    %c1 = arith.constant 1 : index
    %1 = memref.load %arg8[%c0_1, %c1] : memref<1x2xf32, #tpu.memory_space<smem>>
    %c0_2 = arith.constant 0 : index
    %c0_3 = arith.constant 0 : index
    %2 = vector.load %arg6[%c0_2, %c0_3] : memref<16x4xf32, #tpu.memory_space<vmem>>, vector<16x4xf32>
    %c0_4 = arith.constant 0 : index
    %c0_5 = arith.constant 0 : index
    %3 = vector.load %arg7[%c0_4, %c0_5] : memref<4x128xf32, #tpu.memory_space<vmem>>, vector<4x128xf32>
    %cst = arith.constant dense<0.000000e+00> : vector<16x128xf32>
    %4 = tpu.matmul %2, %3, %cst {dimension_numbers = #tpu.dot_dimension_numbers<[1], [0], [0], [1], [0, 0, 1, 1], [], []>} : vector<16x4xf32>, vector<4x128xf32>, vector<16x128xf32> -> vector<16x128xf32>
    %c0_6 = arith.constant 0 : index
    %c0_7 = arith.constant 0 : index
    %5 = vector.load %arg2[%c0_6, %c0_7] : memref<16x6xf32, #tpu.memory_space<vmem>>, vector<16x6xf32>
    %c0_8 = arith.constant 0 : index
    %c0_9 = arith.constant 0 : index
    %6 = vector.load %arg3[%c0_8, %c0_9] : memref<6x128xf32, #tpu.memory_space<vmem>>, vector<6x128xf32>
    %cst_10 = arith.constant dense<0.000000e+00> : vector<16x128xf32>
    %7 = tpu.matmul %5, %6, %cst_10 {dimension_numbers = #tpu.dot_dimension_numbers<[1], [0], [0], [1], [0, 0, 1, 1], [], []>} : vector<16x6xf32>, vector<6x128xf32>, vector<16x128xf32> -> vector<16x128xf32>
    %cst_11 = arith.constant 0.000000e+00 : f32
    %8 = vector.broadcast %cst_11 : f32 to vector<16x128xf32>
    %9 = arith.maximumf %7, %8 : vector<16x128xf32>
    %cst_12 = arith.constant 3.000000e+00 : f32
    %10 = vector.broadcast %cst_12 : f32 to vector<16x128xf32>
    %11 = arith.mulf %10, %9 : vector<16x128xf32>
    %12 = math.sqrt %11 : vector<16x128xf32>
    %cst_13 = arith.constant 1.000000e+00 : f32
    %13 = vector.broadcast %cst_13 : f32 to vector<16x128xf32>
    %14 = arith.addf %13, %12 : vector<16x128xf32>
    %cst_14 = arith.constant 0.000000e+00 : f32
    %15 = vector.broadcast %cst_14 : f32 to vector<16x128xf32>
    %16 = arith.subf %15, %12 : vector<16x128xf32>
    %17 = math.exp %16 : vector<16x128xf32>
    %18 = arith.mulf %14, %17 : vector<16x128xf32>
    %19 = vector.broadcast %0 : f32 to vector<16x128xf32>
    %20 = arith.mulf %19, %18 : vector<16x128xf32>
    %21 = arith.addf %4, %20 : vector<16x128xf32>
    %c0_15 = arith.constant 0 : index
    %c0_16 = arith.constant 0 : index
    %22 = vector.load %arg4[%c0_15, %c0_16] : memref<16x6xf32, #tpu.memory_space<vmem>>, vector<16x6xf32>
    %c0_17 = arith.constant 0 : index
    %c0_18 = arith.constant 0 : index
    %23 = vector.load %arg5[%c0_17, %c0_18] : memref<6x128xf32, #tpu.memory_space<vmem>>, vector<6x128xf32>
    %cst_19 = arith.constant dense<0.000000e+00> : vector<16x128xf32>
    %24 = tpu.matmul %22, %23, %cst_19 {dimension_numbers = #tpu.dot_dimension_numbers<[1], [0], [0], [1], [0, 0, 1, 1], [], []>} : vector<16x6xf32>, vector<6x128xf32>, vector<16x128xf32> -> vector<16x128xf32>
    %cst_20 = arith.constant 0.000000e+00 : f32
    %25 = vector.broadcast %cst_20 : f32 to vector<16x128xf32>
    %26 = arith.maximumf %24, %25 : vector<16x128xf32>
    %cst_21 = arith.constant 5.000000e+00 : f32
    %27 = vector.broadcast %cst_21 : f32 to vector<16x128xf32>
    %28 = arith.mulf %27, %26 : vector<16x128xf32>
    %29 = math.sqrt %28 : vector<16x128xf32>
    %cst_22 = arith.constant 1.000000e+00 : f32
    %30 = vector.broadcast %cst_22 : f32 to vector<16x128xf32>
    %31 = arith.addf %30, %29 : vector<16x128xf32>
    %32 = arith.mulf %29, %29 : vector<16x128xf32>
    %cst_23 = arith.constant 0.333333343 : f32
    %33 = vector.broadcast %cst_23 : f32 to vector<16x128xf32>
    %34 = arith.mulf %32, %33 : vector<16x128xf32>
    %35 = arith.addf %31, %34 : vector<16x128xf32>
    %cst_24 = arith.constant 0.000000e+00 : f32
    %36 = vector.broadcast %cst_24 : f32 to vector<16x128xf32>
    %37 = arith.subf %36, %29 : vector<16x128xf32>
    %38 = math.exp %37 : vector<16x128xf32>
    %39 = arith.mulf %35, %38 : vector<16x128xf32>
    %40 = vector.broadcast %1 : f32 to vector<16x128xf32>
    %41 = arith.mulf %40, %39 : vector<16x128xf32>
    %42 = arith.addf %21, %41 : vector<16x128xf32>
    %c0_25 = arith.constant 0 : index
    %c0_26 = arith.constant 0 : index
    %43 = vector.load %arg9[%c0_25, %c0_26] : memref<16x128xf32, #tpu.memory_space<vmem>>, vector<16x128xf32>
    tpu.vector_store %arg9[%c0_25, %c0_26], %42 {strides = array<i32>} : memref<16x128xf32, #tpu.memory_space<vmem>>, vector<16x128xf32>,
    return
  }
  func.func @transform_0(%arg0: i32, %arg1: i32) -> (i32, i32) {
    %c0_i32 = arith.constant 0 : i32
    %c0_i32_0 = arith.constant 0 : i32
    return %arg0, %c0_i32 : i32, i32
  }
  func.func @transform_1(%arg0: i32, %arg1: i32) -> (i32, i32) {
    %c0_i32 = arith.constant 0 : i32
    %c0_i32_0 = arith.constant 0 : i32
    return %c0_i32, %arg1 : i32, i32
  }
  func.func @transform_2(%arg0: i32, %arg1: i32) -> (i32, i32) {
    %c0_i32 = arith.constant 0 : i32
    %c0_i32_0 = arith.constant 0 : i32
    return %arg0, %c0_i32 : i32, i32
  }
  func.func @transform_3(%arg0: i32, %arg1: i32) -> (i32, i32) {
    %c0_i32 = arith.constant 0 : i32
    %c0_i32_0 = arith.constant 0 : i32
    return %c0_i32, %arg1 : i32, i32
  }
  func.func @transform_4(%arg0: i32, %arg1: i32) -> (i32, i32) {
    %c0_i32 = arith.constant 0 : i32
    %c0_i32_0 = arith.constant 0 : i32
    return %arg0, %c0_i32 : i32, i32
  }
  func.func @transform_5(%arg0: i32, %arg1: i32) -> (i32, i32) {
    %c0_i32 = arith.constant 0 : i32
    %c0_i32_0 = arith.constant 0 : i32
    return %c0_i32, %arg1 : i32, i32
  }
  func.func @transform_6(%arg0: i32, %arg1: i32) -> (i32, i32) {
    %c0_i32 = arith.constant 0 : i32
    %c0_i32_0 = arith.constant 0 : i32
    %c0_i32_1 = arith.constant 0 : i32
    return %c0_i32, %c0_i32_0 : i32, i32
  }
  func.func @transform_7(%arg0: i32, %arg1: i32) -> (i32, i32) {
    %c0_i32 = arith.constant 0 : i32
    return %arg0, %arg1 : i32, i32
  }
}

</mosaic_0001>

<bundles_post_ra>
// kernel: tpu_custom_call.1
= control target key start
LH: loop header
LB: loop body
LE: loop exit
PB: predicated region body
PF: predicated region fallthrough
CT: control target
= control target key end

     0   :  { %12 = vsyncpa [#allocation4], 0  ;;  %s567_s0 = inlined_call_operand.vmem [shape: f32[16,6], index: 0, kind: input, shape index: {}]   ;;  %s568_s1 = inlined_call_operand.vmem [shape: f32[6,128], index: 1, kind: input, shape index: {}]   ;;  %s569_s2 = inlined_call_operand.vmem [shape: f32[16,6], index: 2, kind: input, shape index: {}]   ;;  %s570_s3 = inlined_call_operand.vmem [shape: f32[6,128], index: 3, kind: input, shape index: {}]   ;;  %s571_s4 = inlined_call_operand.vmem [shape: f32[16,4], index: 4, kind: input, shape index: {}]   ;;  %s572_s5 = inlined_call_operand.vmem [shape: f32[4,128], index: 5, kind: input, shape index: {}]   ;;  %s573_s6 = inlined_call_operand.vmem [shape: f32[1,2], index: 6, kind: input, shape index: {}]   ;;  %s574_s7 = inlined_call_operand.hbm [shape: f32[16,128], index: 7, kind: output, shape index: {}]  }
   0x1   :  { %13 = vsyncpa [#allocation3], 0  ;;  %s32_s26 = sshll.u32 %s573_s6, 4  ;;  %s33_s26 = int_to_ptr.vmem [resolvable:$true] %s32_s26 }
   0x2   :  { %s450_s27 = scalar_lea.vmem %s33_s26, 16  ;;  %p455_p1 = scmp.lt.s32.totalorder %s33_s26, %s33_s26 }
   0x3   :  { %p451_p0 = scmp.ne.s32.totalorder %s33_s26, %s450_s27  ;;  %p456_p2 = scmp.lt.s32.totalorder %s450_s27, %s450_s27 }
   0x5   :  { %p457_p3 = por %p456_p2, %p455_p1 }
   0x7   :  { %p458_p4 = pnand %p457_p3, %p451_p0 }
   0x9   :  { %461 = shalt.err (!%p458_p4)
}
   0xa   :  { %s486_s28 = smov [#allocation2]  }
   0xb   :  { %35 = dma.vmem_to_smem %s33_s26, 16, %s486_s28, [#allocation4]  }
   0xc   :  { %482 = dma.done.wait [#allocation4], 16  }
   0xd   :  { %483 = vsyncadd [#allocation4], 4294967280 }
   0xe   :  { %39 = sfence }
   0xf   :  { %v47_v0 = vld [vmem:[%s568_s1] sm:$0x3f]  ;;  %vm55_vm0 = vcmask 1045504   ;;  %vm48_vm1 = vcmask 48128   ;;  %v46_v2 = vld [vmem:[%s567_s0 + $0x8] sm:$0xff]  ;;  %vm172_vm2 = vcmask 1043456  }
  0x10   :  { %v45_v1 = vld [vmem:[%s567_s0] sm:$0xff]  ;;  %415 = vmatprep.subr.msk.mxu0 %vm55_vm0, %v47_v0  ;;  %vm165_vm3 = vcmask 31744   ;;  %v252_v7 = vld [vmem:[%s569_s2 + $0x8] sm:$0xff] }
  0x11   :  { %417 = vmatprep.mubr.msk.f32.mxu0 %vm48_vm1, %v45_v1  ;;  %v253_v3 = vld [vmem:[%s570_s3] sm:$0x3f]  ;;  %416 = vmatpush3.msk.msra.mxu0 %vm55_vm0, %v47_v0  ;;  %v43_v8 = vld [vmem:[%s571_s4 + $0x8] sm:$0xff] }
  0x12   :  { %v251_v4 = vld [vmem:[%s569_s2] sm:$0xff]  ;;  %418 = vmatmul.mubr.msk.f32.vlgmr.msra.gmra.mxu0 %vm48_vm1, %v46_v2  ;;  %425 = vmatprep.subr.msk.mxu0 %vm55_vm0, %v253_v3  ;;  %s40_s2 = sld [smem:[#allocation2]] }
  0x13   :  { %v44_v5 = vld [vmem:[%s572_s5] sm:$0xf]  ;;  %426 = vmatpush3.msk.msra.mxu0 %vm55_vm0, %v253_v3  ;;  %427 = vmatprep.mubr.msk.f32.mxu0 %vm48_vm1, %v251_v4  ;;  %s487_s5 = smov [#allocation5]  }
  0x14   :  { %v42_v6 = vld [vmem:[%s571_s4] sm:$0xff]  ;;  %420 = vmatprep.subr.msk.mxu1 %vm172_vm2, %v44_v5  ;;  %s396_s4 = sld [smem:[#allocation2 + $0x1]]  ;;  %s384_s20 = sshll.u32 %s487_s5, 4  ;;  %s385_s20 = int_to_ptr.vmem [resolvable:$true] %s384_s20 }
  0x15   :  { %422 = vmatprep.mubr.msk.f32.mxu1 %vm165_vm3, %v42_v6  ;;  %421 = vmatpush3.msk.msra.mxu1 %vm172_vm2, %v44_v5  ;;  %s462_s21 = scalar_lea.vmem %s385_s20, 256  ;;  %p467_p6 = scmp.lt.s32.totalorder %s385_s20, %s385_s20 }
  0x16   :  { %428 = vmatmul.mubr.msk.f32.vlgmr.msra.gmra.mxu0 %vm48_vm1, %v252_v7  ;;  %423 = vmatmul.mubr.msk.f32.vlgmr.msra.gmra.mxu1 %vm165_vm3, %v43_v8  ;;  %p463_p5 = scmp.ne.s32.totalorder %s385_s20, %s462_s21  ;;  %p468_p7 = scmp.lt.s32.totalorder %s462_s21, %s462_s21 }
  0x18   :  { %v162_v54 = vstv %s40_s2  ;;  %p469_p8 = por %p468_p7, %p467_p6 }
  0x1a   :  { %v372_v0 = vstv %s396_s4  ;;  %p470_p9 = pnand %p469_p8, %p463_p5 }
  0xd2   :  { %v419_v9 = vpop.f32.mrf.mxu0 }
  0xd3   :  { %v135_v10 = vmax.f32 %v419_v9, 0.0 }
  0xd4   :  { %v125_v11 = vpop.f32.mrf.mxu0 }
  0xd5   :  { %v137_v12 = vmul.f32 3.0, %v135_v10  ;;  %v134_v13 = vmax.f32 %v125_v11, 0.0 }
  0xd6   :  { %v429_v14 = vpop.f32.mrf.mxu0  ;;  %v424_v61 = vpop.f32.mrf.mxu1 }
  0xd7   :  { %434 = vrsqrt.f32 %v137_v12  ;;  %v136_v15 = vmul.f32 3.0, %v134_v13  ;;  %v339_v16 = vmax.f32 %v429_v14, 0.0  ;;  %vm147_vm4 = vcmp.eq.f32.partialorder %v137_v12, inf }
  0xd8   :  { %v329_v17 = vpop.f32.mrf.mxu0  ;;  %v150_v24 = vand.u32 2147483648, %v137_v12  ;;  %vm149_vm5 = vcmp.eq.f32.partialorder %v137_v12, 0.0  ;;  %v242_v9 = vpop.f32.mrf.mxu1 }
  0xd9   :  { %436 = vrsqrt.f32 %v136_v15  ;;  %v341_v18 = vmul.f32 5.0, %v339_v16  ;;  %v338_v19 = vmax.f32 %v329_v17, 0.0  ;;  %vm140_vm6 = vcmp.eq.f32.partialorder %v136_v15, inf }
  0xda   :  { %v143_v29 = vand.u32 2147483648, %v136_v15  ;;  %vm142_vm7 = vcmp.eq.f32.partialorder %v136_v15, 0.0 }
  0xdb   :  { %438 = vrsqrt.f32 %v341_v18  ;;  %v340_v20 = vmul.f32 5.0, %v338_v19  ;;  %vm351_vm8 = vcmp.eq.f32.partialorder %v341_v18, inf  ;;  %v354_v34 = vand.u32 2147483648, %v341_v18 }
  0xdc   :  { %vm353_vm9 = vcmp.eq.f32.partialorder %v341_v18, 0.0 }
  0xdd   :  { %440 = vrsqrt.f32 %v340_v20  ;;  %vm344_vm10 = vcmp.eq.f32.partialorder %v340_v20, inf  ;;  %v347_v42 = vand.u32 2147483648, %v340_v20  ;;  %vm346_vm11 = vcmp.eq.f32.partialorder %v340_v20, 0.0 }
  0xe4   :  { %v435_v21 = vpop.eup %434 }
  0xe5   :  { %v146_v22 = vmul.f32 %v435_v21, %v137_v12 }
  0xe6   :  { %v437_v23 = vpop.eup %436 }
  0xe7   :  { %v148_v25 = vsel %vm147_vm4, %v137_v12, %v146_v22  ;;  %v139_v26 = vmul.f32 %v437_v23, %v136_v15 }
  0xe8   :  { %v439_v27 = vpop.eup %438  ;;  %v151_v28 = vsel %vm149_vm5, %v150_v24, %v148_v25 }
  0xe9   :  { %v350_v30 = vmul.f32 %v439_v27, %v341_v18  ;;  %v155_v31 = vsub.f32 0.0, %v151_v28  ;;  %v141_v32 = vsel %vm140_vm6, %v136_v15, %v139_v26  ;;  %v153_v51 = vadd.f32 1.0, %v151_v28 }
  0xea   :  { %v441_v33 = vpop.eup %440  ;;  %v144_v35 = vsel %vm142_vm7, %v143_v29, %v141_v32 }
  0xeb   :  { %v343_v36 = vmul.f32 %v441_v33, %v340_v20  ;;  %v158_v37 = vmul.f32 1.442695, %v155_v31  ;;  %v352_v38 = vsel %vm351_vm8, %v341_v18, %v350_v30  ;;  %v154_v40 = vsub.f32 0.0, %v144_v35 }
  0xec   :  { %v355_v39 = vsel %vm353_vm9, %v354_v34, %v352_v38  ;;  %v152_v57 = vadd.f32 1.0, %v144_v35 }
  0xed   :  { %442 = vpow2.f32 %v158_v37  ;;  %v365_v41 = vsub.f32 0.0, %v355_v39  ;;  %v156_v43 = vmul.f32 1.442695, %v154_v40  ;;  %v345_v44 = vsel %vm344_vm10, %v340_v20, %v343_v36 }
  0xee   :  { %v348_v46 = vsel %vm346_vm11, %v347_v42, %v345_v44  ;;  %v359_v49 = vmul.f32 %v355_v39, %v355_v39  ;;  %v357_v56 = vadd.f32 1.0, %v355_v39 }
  0xef   :  { %v368_v45 = vmul.f32 1.442695, %v365_v41  ;;  %444 = vpow2.f32 %v156_v43  ;;  %v364_v47 = vsub.f32 0.0, %v348_v46  ;;  %v358_v50 = vmul.f32 %v348_v46, %v348_v46 }
  0xf0   :  { %v361_v52 = vmul.f32 0.33333334, %v359_v49  ;;  %v356_v2 = vadd.f32 1.0, %v348_v46 }
  0xf1   :  { %446 = vpow2.f32 %v368_v45  ;;  %v366_v48 = vmul.f32 1.442695, %v364_v47  ;;  %v360_v58 = vmul.f32 0.33333334, %v358_v50 }
  0xf2   :  { %v363_v62 = vadd.f32 %v361_v52, %v357_v56 }
  0xf3   :  { %448 = vpow2.f32 %v366_v48  ;;  %v362_v5 = vadd.f32 %v360_v58, %v356_v2 }
  0xfa   :  { %v443_v53 = vpop.eup %442 }
  0xfb   :  { %v161_v55 = vmul.f32 %v443_v53, %v153_v51 }
  0xfc   :  { %v445_v59 = vpop.eup %444 }
  0xfd   :  { %v164_v60 = vmul.f32 %v162_v54, %v161_v55  ;;  %v160_v1 = vmul.f32 %v445_v59, %v152_v57 }
  0xfe   :  { %v447_v63 = vpop.eup %446 }
  0xff   :  { %v371_v3 = vmul.f32 %v447_v63, %v363_v62  ;;  %v163_v4 = vmul.f32 %v162_v54, %v160_v1  ;;  %v248_v7 = vadd.f32 %v424_v61, %v164_v60 }
 0x100   :  { %v449_v6 = vpop.eup %448 }
 0x101   :  { %v374_v8 = vmul.f32 %v372_v0, %v371_v3  ;;  %v370_v10 = vmul.f32 %v449_v6, %v362_v5  ;;  %v243_v12 = vadd.f32 %v242_v9, %v163_v4 }
 0x103   :  { %v376_v11 = vadd.f32 %v374_v8, %v248_v7  ;;  %v373_v13 = vmul.f32 %v372_v0, %v370_v10 }
 0x105   :  { %378 = vst [vmem:[#allocation5 + $0x8] sm:$0xff] %v376_v11  ;;  %v375_v14 = vadd.f32 %v373_v13, %v243_v12 }
 0x107   :  { %377 = vst [vmem:[#allocation5] sm:$0xff] %v375_v14 }
 0x108   :  { %473 = shalt.err (!%p470_p9)
}
 0x109   :  { %s488_s22 = smov 128   ;;  %s489_s23 = smov 8  }
 0x10a   :  { %390 = dma.vmem_to_hbm [thread:$0]  %s385_s20, 256, %s574_s7, [#allocation3], %s488_s22, %s488_s22, %s489_s23  }
 0x10b   :  { %484 = dma.done.wait [#allocation3], 256  }
 0x10c   :  { %485 = vsyncadd [#allocation3], 4294967040 }
 0x10d   :  { %394 = vsyncpa [#allocation3], 1 }
 0x10e   :  { %395 = vsyncpa [#allocation4], 1 }

</bundles_post_ra>
